<compile_context>
chip_gen: v7x
topology: tpu7x:2x2x1
jax: 0.10.0
libtpu: 0.0.40
codegen_flags: <defaults>
</compile_context>

<pallas_src>
import functools
import math

import jax
import jax.numpy as jnp
from jax.experimental import pallas as pl
from jax.experimental.pallas import tpu as pltpu


_MASK_FILL = -1.0e6    # matches the reference masked_softmax fill value
_PAD_FILL = -1.0e30    # key columns that only exist because of tile padding


def _round_up(x, m):
    return ((x + m - 1) // m) * m


def _attn_kernel(vl_ref, q_ref, k_ref, v_ref, o_ref,
                 m_scr, l_scr, acc_scr, *, scale, lk_real, lk_pad):
    ki = pl.program_id(2)
    nk = pl.num_programs(2)

    @pl.when(ki == 0)
    def _():
        m_scr[...] = jnp.full(m_scr.shape, -jnp.inf, jnp.float32)
        l_scr[...] = jnp.zeros(l_scr.shape, jnp.float32)
        acc_scr[...] = jnp.zeros(acc_scr.shape, jnp.float32)

    q = q_ref[0]           # (TQ, d)
    k = k_ref[0]           # (TK, d)
    v = v_ref[0]           # (TK, dv)
    vl = vl_ref[0]         # (TQ, 1) int32 per-query-row valid length

    tk = k.shape[0]

    # QK^T contracting the last dim of both operands -> feeds the MXU directly,
    # no in-kernel transpose / relayout of the K tile.
    s = jax.lax.dot_general(
        q, k, dimension_numbers=(((1,), (1,)), ((), ())),
        preferred_element_type=jnp.float32)
    s = s * jnp.float32(scale)                                    # (TQ, TK)

    # Build the keep-mask in-kernel from the tiny per-row valid-length vector;
    # no O(B*Lq*Lk) f32 mask ever touches HBM.
    col = jax.lax.broadcasted_iota(jnp.int32, s.shape, 1) + ki * tk
    s = jnp.where(col < vl, s, jnp.float32(_MASK_FILL))           # ref semantics
    if lk_pad != lk_real:
        # Columns past the true Lk exist only because of tile padding; push them
        # far below the -1e6 reference fill so they get exactly zero weight.
        s = jnp.where(col < lk_real, s, jnp.float32(_PAD_FILL))

    # Online (flash-style) softmax accumulation across K tiles.
    m_prev = m_scr[...]
    m_cur = jnp.max(s, axis=-1, keepdims=True)
    m_new = jnp.maximum(m_prev, m_cur)
    alpha = jnp.exp(m_prev - m_new)                                # 0 on first tile
    p = jnp.exp(s - m_new)
    l_scr[...] = alpha * l_scr[...] + jnp.sum(p, axis=-1, keepdims=True)
    acc_scr[...] = alpha * acc_scr[...] + jnp.dot(
        p.astype(v.dtype), v, preferred_element_type=jnp.float32)
    m_scr[...] = m_new

    @pl.when(ki == nk - 1)
    def _():
        l = l_scr[...]
        inv = pl.reciprocal(l, approx=True)      # EUP slot (VALU stays free)
        inv = inv * (2.0 - l * inv)              # one Newton step -> ~f32 accuracy
        # Dropout(p) in eval mode is identity.
        # TODO(synk): training-mode dropout (stateful RNG mask) not modeled.
        o_ref[0] = (acc_scr[...] * inv).astype(o_ref.dtype)


def dot_product_attention(queries, keys, values, valid_lens=None,
                          *, block_q=128, block_k=256):
    """Pallas TPU implementation of DotProductAttention.forward (eval mode)."""
    B, Lq, d = queries.shape
    Bk, Lk, dk = keys.shape
    Bv, Lkv, dv = values.shape
    assert B == Bk == Bv and d == dk and Lk == Lkv

    # Per-(batch, query-row) valid length, int32, clipped to Lk.  This replaces
    # the old materialized (B, Lq, Lk) f32 mask (Lk x less HBM traffic) and
    # uniformly supports None / 1-D / 2-D valid_lens.
    if valid_lens is None:
        vl = jnp.full((B, Lq), Lk, jnp.int32)
    elif valid_lens.ndim == 1:
        vl = jnp.broadcast_to(valid_lens.astype(jnp.int32)[:, None], (B, Lq))
    else:
        vl = valid_lens.astype(jnp.int32)
    vl = jnp.minimum(vl, jnp.int32(Lk))

    # Tile sizes: sublane-aligned TQ, lane-aligned TK.  Defaults (128, 256) keep
    # double-buffered Q/K/V tiles + f32 accumulators small enough for v7x's
    # tighter VMEM budget while staying MXU-shaped on v5e/v6e/v7x.
    tq = min(_round_up(block_q, 8), _round_up(Lq, 8))
    tk = min(_round_up(block_k, 128), _round_up(Lk, 128))
    lq_pad = _round_up(Lq, tq)
    lk_pad = _round_up(Lk, tk)

    if lq_pad != Lq:
        queries = jnp.pad(queries, ((0, 0), (0, lq_pad - Lq), (0, 0)))
        vl = jnp.pad(vl, ((0, 0), (0, lq_pad - Lq)))          # padded rows: vl = 0
    if lk_pad != Lk:
        keys = jnp.pad(keys, ((0, 0), (0, lk_pad - Lk), (0, 0)))
        values = jnp.pad(values, ((0, 0), (0, lk_pad - Lk), (0, 0)))
    vl = vl[:, :, None]                                        # (B, lq_pad, 1)

    grid = (B, lq_pad // tq, lk_pad // tk)
    kernel = functools.partial(
        _attn_kernel, scale=1.0 / math.sqrt(d), lk_real=Lk, lk_pad=lk_pad)

    out = pl.pallas_call(
        kernel,
        out_shape=jax.ShapeDtypeStruct((B, lq_pad, dv), queries.dtype),
        grid_spec=pltpu.PrefetchScalarGridSpec(
            num_scalar_prefetch=0,
            grid=grid,
            in_specs=[
                pl.BlockSpec((1, tq, 1), lambda b, qi, ki: (b, qi, 0)),   # valid lens
                pl.BlockSpec((1, tq, d), lambda b, qi, ki: (b, qi, 0)),   # Q
                pl.BlockSpec((1, tk, d), lambda b, qi, ki: (b, ki, 0)),   # K
                pl.BlockSpec((1, tk, dv), lambda b, qi, ki: (b, ki, 0)),  # V
            ],
            out_specs=pl.BlockSpec((1, tq, dv), lambda b, qi, ki: (b, qi, 0)),
            scratch_shapes=[
                pltpu.VMEM((tq, 1), jnp.float32),    # running max m
                pltpu.VMEM((tq, 1), jnp.float32),    # running denom l
                pltpu.VMEM((tq, dv), jnp.float32),   # output accumulator
            ],
        ),
        compiler_params=pltpu.CompilerParams(
            dimension_semantics=("parallel", "parallel", "arbitrary"),
            vmem_limit_bytes=32 * 1024 * 1024,
        ),
    )(vl, queries, keys, values)

    return out[:, :Lq, :]


def _reference(queries, keys, values, valid_lens=None):
    d = queries.shape[-1]
    scores = jnp.einsum("bqd,bkd->bqk", queries, keys) / math.sqrt(d)
    if valid_lens is not None:
        if valid_lens.ndim == 1:
            vl = jnp.broadcast_to(valid_lens[:, None], scores.shape[:2])
        else:
            vl = valid_lens
        keep = jnp.arange(scores.shape[-1])[None, None, :] < vl[:, :, None]
        scores = jnp.where(keep, scores, -1000000.0)
    w = jax.nn.softmax(scores, axis=-1)
    return jnp.einsum("bqk,bkv->bqv", w, values)


if __name__ == "__main__":
    key = jax.random.PRNGKey(0)
    kq, kk, kv = jax.random.split(key, 3)

    B, Lq, Lk, d, dv = 2, 8, 8, 32, 32
    queries = jax.random.normal(kq, (B, Lq, d), dtype=jnp.float32)
    keys = jax.random.normal(kk, (B, Lk, d), dtype=jnp.float32)
    values = jax.random.normal(kv, (B, Lk, dv), dtype=jnp.float32)
    valid_lens = jnp.array([3, 6], dtype=jnp.int32)

    out = jax.block_until_ready(dot_product_attention(queries, keys, values, valid_lens))
    ref = _reference(queries, keys, values, valid_lens)
    assert out.shape == (B, Lq, dv)
    assert jnp.allclose(out, ref, atol=1e-4, rtol=1e-4)

    # valid_lens = None path.
    out_none = jax.block_until_ready(dot_product_attention(queries, keys, values, None))
    assert jnp.allclose(out_none, _reference(queries, keys, values, None),
                        atol=1e-4, rtol=1e-4)

    # 2-D (per-query-row) valid_lens path.
    vl2d = jnp.array([[1, 2, 3, 4, 5, 6, 7, 8],
                      [8, 7, 6, 5, 4, 3, 2, 1]], dtype=jnp.int32)
    out_2d = jax.block_until_ready(dot_product_attention(queries, keys, values, vl2d))
    assert jnp.allclose(out_2d, _reference(queries, keys, values, vl2d),
                        atol=1e-4, rtol=1e-4)

    # Larger shape exercising multi-K-tile online softmax + Lq/Lk padding.
    key2 = jax.random.PRNGKey(1)
    kq2, kk2, kv2 = jax.random.split(key2, 3)
    B2, Lq2, Lk2, d2, dv2 = 2, 40, 200, 16, 24
    q2 = jax.random.normal(kq2, (B2, Lq2, d2), dtype=jnp.float32)
    k2 = jax.random.normal(kk2, (B2, Lk2, d2), dtype=jnp.float32)
    v2 = jax.random.normal(kv2, (B2, Lk2, dv2), dtype=jnp.float32)
    vl2 = jnp.array([150, 37], dtype=jnp.int32)
    out2 = jax.block_until_ready(
        dot_product_attention(q2, k2, v2, vl2, block_q=32, block_k=128))
    assert jnp.allclose(out2, _reference(q2, k2, v2, vl2), atol=1e-4, rtol=1e-4)

    print("KERNEL_OK")
</pallas_src>

<mosaic_0001>
module attributes {stable_mosaic.version = 11 : i64} {
  func.func @_attn_kernel(%arg0: i32, %arg1: i32, %arg2: i32, %arg3: memref<1x8x1xi32, #tpu.memory_space<vmem>>, %arg4: memref<1x8x32xf32, #tpu.memory_space<vmem>>, %arg5: memref<1x128x32xf32, #tpu.memory_space<vmem>>, %arg6: memref<1x128x32xf32, #tpu.memory_space<vmem>>, %arg7: memref<1x8x32xf32, #tpu.memory_space<vmem>>, %arg8: memref<8x1xf32, #tpu.memory_space<vmem>>, %arg9: memref<8x1xf32, #tpu.memory_space<vmem>>, %arg10: memref<8x32xf32, #tpu.memory_space<vmem>>) attributes {dimension_semantics = [#tpu.dimension_semantics<parallel>, #tpu.dimension_semantics<parallel>, #tpu.dimension_semantics<arbitrary>], iteration_bounds = array<i64: 2, 1, 1>, scalar_prefetch = 0 : i64, scratch_operands = 3 : i64, tpu.core_type = #tpu.core_type<tc>, window_params = [{transform_indices = @transform_0, window_bounds = array<i64: 1, 8, 1>}, {transform_indices = @transform_1, window_bounds = array<i64: 1, 8, 32>}, {transform_indices = @transform_2, window_bounds = array<i64: 1, 128, 32>}, {transform_indices = @transform_3, window_bounds = array<i64: 1, 128, 32>}, {transform_indices = @transform_4, window_bounds = array<i64: 1, 8, 32>}]} {
    %c0_i32 = arith.constant 0 : i32
    %0 = arith.cmpi eq, %arg2, %c0_i32 : i32
    %1 = arith.extui %0 : i1 to i32
    %c0_i32_0 = arith.constant 0 : i32
    %2 = arith.cmpi ne, %1, %c0_i32_0 : i32
    scf.if %2 {
      %cst_32 = arith.constant 0xFF800000 : f32
      %51 = vector.broadcast %cst_32 : f32 to vector<8x1xf32>
      %c0_33 = arith.constant 0 : index
      %c0_34 = arith.constant 0 : index
      %52 = vector.load %arg8[%c0_33, %c0_34] : memref<8x1xf32, #tpu.memory_space<vmem>>, vector<8x1xf32>
      tpu.vector_store %arg8[%c0_33, %c0_34], %51 {strides = array<i32>} : memref<8x1xf32, #tpu.memory_space<vmem>>, vector<8x1xf32>,
      %cst_35 = arith.constant 0.000000e+00 : f32
      %53 = vector.broadcast %cst_35 : f32 to vector<8x1xf32>
      %c0_36 = arith.constant 0 : index
      %c0_37 = arith.constant 0 : index
      %54 = vector.load %arg9[%c0_36, %c0_37] : memref<8x1xf32, #tpu.memory_space<vmem>>, vector<8x1xf32>
      tpu.vector_store %arg9[%c0_36, %c0_37], %53 {strides = array<i32>} : memref<8x1xf32, #tpu.memory_space<vmem>>, vector<8x1xf32>,
      %cst_38 = arith.constant 0.000000e+00 : f32
      %55 = vector.broadcast %cst_38 : f32 to vector<8x32xf32>
      %c0_39 = arith.constant 0 : index
      %c0_40 = arith.constant 0 : index
      %56 = vector.load %arg10[%c0_39, %c0_40] : memref<8x32xf32, #tpu.memory_space<vmem>>, vector<8x32xf32>
      tpu.vector_store %arg10[%c0_39, %c0_40], %55 {strides = array<i32>} : memref<8x32xf32, #tpu.memory_space<vmem>>, vector<8x32xf32>,
    } else {
    }
    %c0 = arith.constant 0 : index
    %c0_1 = arith.constant 0 : index
    %c0_2 = arith.constant 0 : index
    %3 = vector.load %arg4[%c0, %c0_1, %c0_2] : memref<1x8x32xf32, #tpu.memory_space<vmem>>, vector<1x8x32xf32>
    %4 = vector.shape_cast %3 : vector<1x8x32xf32> to vector<8x32xf32>
    %c0_3 = arith.constant 0 : index
    %c0_4 = arith.constant 0 : index
    %c0_5 = arith.constant 0 : index
    %5 = vector.load %arg5[%c0_3, %c0_4, %c0_5] : memref<1x128x32xf32, #tpu.memory_space<vmem>>, vector<1x128x32xf32>
    %6 = vector.shape_cast %5 : vector<1x128x32xf32> to vector<128x32xf32>
    %c0_6 = arith.constant 0 : index
    %c0_7 = arith.constant 0 : index
    %c0_8 = arith.constant 0 : index
    %7 = vector.load %arg6[%c0_6, %c0_7, %c0_8] : memref<1x128x32xf32, #tpu.memory_space<vmem>>, vector<1x128x32xf32>
    %8 = vector.shape_cast %7 : vector<1x128x32xf32> to vector<128x32xf32>
    %c0_9 = arith.constant 0 : index
    %c0_10 = arith.constant 0 : index
    %c0_11 = arith.constant 0 : index
    %9 = vector.load %arg3[%c0_9, %c0_10, %c0_11] : memref<1x8x1xi32, #tpu.memory_space<vmem>>, vector<1x8x1xi32>
    %10 = vector.shape_cast %9 : vector<1x8x1xi32> to vector<8x1xi32>
    %cst = arith.constant dense<0.000000e+00> : vector<8x128xf32>
    %11 = tpu.matmul %4, %6, %cst {dimension_numbers = #tpu.dot_dimension_numbers<[1], [1], [0], [0], [0, 0, 1, 0], [], []>} : vector<8x32xf32>, vector<128x32xf32>, vector<8x128xf32> -> vector<8x128xf32>
    %cst_12 = arith.constant 0.176776692 : f32
    %12 = vector.broadcast %cst_12 : f32 to vector<8x128xf32>
    %13 = arith.mulf %11, %12 : vector<8x128xf32>
    %14 = tpu.iota {dimensions = array<i32: 1>} : vector<8x128xi32>
    %c128_i32 = arith.constant 128 : i32
    %15 = arith.muli %arg2, %c128_i32 : i32
    %16 = vector.broadcast %15 : i32 to vector<8x128xi32>
    %17 = arith.addi %14, %16 : vector<8x128xi32>
    %18 = vector.broadcast %10 : vector<8x1xi32> to vector<8x128xi32>
    %19 = arith.cmpi slt, %17, %18 : vector<8x128xi32>
    %cst_13 = arith.constant -1.000000e+06 : f32
    %20 = vector.broadcast %cst_13 : f32 to vector<8x128xf32>
    %21 = arith.select %19, %13, %20 : vector<8x128xi1>, vector<8x128xf32>
    %c8_i32 = arith.constant 8 : i32
    %22 = vector.broadcast %c8_i32 : i32 to vector<8x128xi32>
    %23 = arith.cmpi slt, %17, %22 : vector<8x128xi32>
    %cst_14 = arith.constant -1.000000e+30 : f32
    %24 = vector.broadcast %cst_14 : f32 to vector<8x128xf32>
    %25 = arith.select %23, %21, %24 : vector<8x128xi1>, vector<8x128xf32>
    %c0_15 = arith.constant 0 : index
    %c0_16 = arith.constant 0 : index
    %26 = vector.load %arg8[%c0_15, %c0_16] : memref<8x1xf32, #tpu.memory_space<vmem>>, vector<8x1xf32>
    %cst_17 = arith.constant dense<0xFF800000> : vector<8xf32>
    %27 = vector.multi_reduction <maximumf>, %25, %cst_17 [1] : vector<8x128xf32> to vector<8xf32>
    %28 = vector.shape_cast %27 : vector<8xf32> to vector<8x1xf32>
    %29 = arith.maximumf %26, %28 : vector<8x1xf32>
    %30 = arith.subf %26, %29 : vector<8x1xf32>
    %31 = math.exp %30 : vector<8x1xf32>
    %32 = vector.broadcast %29 : vector<8x1xf32> to vector<8x128xf32>
    %33 = arith.subf %25, %32 : vector<8x128xf32>
    %34 = math.exp %33 : vector<8x128xf32>
    %c0_18 = arith.constant 0 : index
    %c0_19 = arith.constant 0 : index
    %35 = vector.load %arg9[%c0_18, %c0_19] : memref<8x1xf32, #tpu.memory_space<vmem>>, vector<8x1xf32>
    %36 = arith.mulf %31, %35 : vector<8x1xf32>
    %cst_20 = arith.constant dense<0.000000e+00> : vector<8xf32>
    %37 = vector.multi_reduction <add>, %34, %cst_20 [1] : vector<8x128xf32> to vector<8xf32>
    %38 = vector.shape_cast %37 : vector<8xf32> to vector<8x1xf32>
    %39 = arith.addf %36, %38 : vector<8x1xf32>
    %c0_21 = arith.constant 0 : index
    %c0_22 = arith.constant 0 : index
    %40 = vector.load %arg9[%c0_21, %c0_22] : memref<8x1xf32, #tpu.memory_space<vmem>>, vector<8x1xf32>
    tpu.vector_store %arg9[%c0_21, %c0_22], %39 {strides = array<i32>} : memref<8x1xf32, #tpu.memory_space<vmem>>, vector<8x1xf32>,
    %c0_23 = arith.constant 0 : index
    %c0_24 = arith.constant 0 : index
    %41 = vector.load %arg10[%c0_23, %c0_24] : memref<8x32xf32, #tpu.memory_space<vmem>>, vector<8x32xf32>
    %42 = vector.broadcast %31 : vector<8x1xf32> to vector<8x32xf32>
    %43 = arith.mulf %42, %41 : vector<8x32xf32>
    %cst_25 = arith.constant dense<0.000000e+00> : vector<8x32xf32>
    %44 = tpu.matmul %34, %8, %cst_25 {dimension_numbers = #tpu.dot_dimension_numbers<[1], [0], [0], [1], [0, 0, 1, 1], [], []>} : vector<8x128xf32>, vector<128x32xf32>, vector<8x32xf32> -> vector<8x32xf32>
    %45 = arith.addf %43, %44 : vector<8x32xf32>
    %c0_26 = arith.constant 0 : index
    %c0_27 = arith.constant 0 : index
    %46 = vector.load %arg10[%c0_26, %c0_27] : memref<8x32xf32, #tpu.memory_space<vmem>>, vector<8x32xf32>
    tpu.vector_store %arg10[%c0_26, %c0_27], %45 {strides = array<i32>} : memref<8x32xf32, #tpu.memory_space<vmem>>, vector<8x32xf32>,
    %c0_28 = arith.constant 0 : index
    %c0_29 = arith.constant 0 : index
    %47 = vector.load %arg8[%c0_28, %c0_29] : memref<8x1xf32, #tpu.memory_space<vmem>>, vector<8x1xf32>
    tpu.vector_store %arg8[%c0_28, %c0_29], %29 {strides = array<i32>} : memref<8x1xf32, #tpu.memory_space<vmem>>, vector<8x1xf32>,
    %c0_i32_30 = arith.constant 0 : i32
    %48 = arith.cmpi eq, %arg2, %c0_i32_30 : i32
    %49 = arith.extui %48 : i1 to i32
    %c0_i32_31 = arith.constant 0 : i32
    %50 = arith.cmpi ne, %49, %c0_i32_31 : i32
    scf.if %50 {
      %c0_32 = arith.constant 0 : index
      %c0_33 = arith.constant 0 : index
      %51 = vector.load %arg9[%c0_32, %c0_33] : memref<8x1xf32, #tpu.memory_space<vmem>>, vector<8x1xf32>
      %52 = tpu.reciprocal %51 {approx = true} : vector<8x1xf32> -> vector<8x1xf32>
      %53 = arith.mulf %51, %52 : vector<8x1xf32>
      %cst_34 = arith.constant 2.000000e+00 : f32
      %54 = vector.broadcast %cst_34 : f32 to vector<8x1xf32>
      %55 = arith.subf %54, %53 : vector<8x1xf32>
      %56 = arith.mulf %52, %55 : vector<8x1xf32>
      %c0_35 = arith.constant 0 : index
      %c0_36 = arith.constant 0 : index
      %57 = vector.load %arg10[%c0_35, %c0_36] : memref<8x32xf32, #tpu.memory_space<vmem>>, vector<8x32xf32>
      %58 = vector.broadcast %56 : vector<8x1xf32> to vector<8x32xf32>
      %59 = arith.mulf %57, %58 : vector<8x32xf32>
      %c0_37 = arith.constant 0 : index
      %c0_38 = arith.constant 0 : index
      %c0_39 = arith.constant 0 : index
      %60 = vector.load %arg7[%c0_37, %c0_38, %c0_39] : memref<1x8x32xf32, #tpu.memory_space<vmem>>, vector<1x8x32xf32>
      %61 = vector.shape_cast %60 : vector<1x8x32xf32> to vector<8x32xf32>
      %62 = vector.shape_cast %59 : vector<8x32xf32> to vector<1x8x32xf32>
      tpu.vector_store %arg7[%c0_37, %c0_38, %c0_39], %62 {strides = array<i32>} : memref<1x8x32xf32, #tpu.memory_space<vmem>>, vector<1x8x32xf32>,
    } else {
    }
    return
  }
  func.func @transform_0(%arg0: i32, %arg1: i32, %arg2: i32) -> (i32, i32, i32) {
    %c0_i32 = arith.constant 0 : i32
    %c0_i32_0 = arith.constant 0 : i32
    return %arg0, %arg1, %c0_i32 : i32, i32, i32
  }
  func.func @transform_1(%arg0: i32, %arg1: i32, %arg2: i32) -> (i32, i32, i32) {
    %c0_i32 = arith.constant 0 : i32
    %c0_i32_0 = arith.constant 0 : i32
    return %arg0, %arg1, %c0_i32 : i32, i32, i32
  }
  func.func @transform_2(%arg0: i32, %arg1: i32, %arg2: i32) -> (i32, i32, i32) {
    %c0_i32 = arith.constant 0 : i32
    %c0_i32_0 = arith.constant 0 : i32
    return %arg0, %arg2, %c0_i32 : i32, i32, i32
  }
  func.func @transform_3(%arg0: i32, %arg1: i32, %arg2: i32) -> (i32, i32, i32) {
    %c0_i32 = arith.constant 0 : i32
    %c0_i32_0 = arith.constant 0 : i32
    return %arg0, %arg2, %c0_i32 : i32, i32, i32
  }
  func.func @transform_4(%arg0: i32, %arg1: i32, %arg2: i32) -> (i32, i32, i32) {
    %c0_i32 = arith.constant 0 : i32
    %c0_i32_0 = arith.constant 0 : i32
    return %arg0, %arg1, %c0_i32 : i32, i32, i32
  }
}

</mosaic_0001>

<bundles_post_ra>
// kernel: tpu_custom_call.1
= control target key start
LH: loop header
LB: loop body
LE: loop exit
PB: predicated region body
PF: predicated region fallthrough
CT: control target
= control target key end

     0   :  { %9 = vsyncpa [#allocation6], 0  ;;  %s1350_s0 = inlined_call_operand.vmem [shape: s32[2,8,1], index: 0, kind: input, shape index: {}]   ;;  %s1351_s1 = inlined_call_operand.vmem [shape: f32[2,8,32], index: 1, kind: input, shape index: {}]   ;;  %s1352_s2 = inlined_call_operand.vmem [shape: f32[2,128,32], index: 2, kind: input, shape index: {}]   ;;  %s1353_s3 = inlined_call_operand.vmem [shape: f32[2,128,32], index: 3, kind: input, shape index: {}]   ;;  %s1354_s4 = inlined_call_operand.hbm [shape: f32[2,8,32], index: 4, kind: output, shape index: {}]  }
   0x1   :  { %11 = vsyncpa [#allocation6 + $0x1], 0  ;;  %s1135_s15 = smov 0   ;;  %s1137_s16 = smov 0  }
   0x2   :  { %s1139_s17 = smov 0   ;;  %s1141_s18 = smov 0  }
   0x3   :  { %s1143_s19 = smov 0   ;;  %s1145_s20 = smov 0  }
   0x4 LB: > { %s761_s21 = sadd.s32 4294967295, %s1102_s20   ;;  %s762_s22 = sadd.s32 4294967294, %s1102_s20   ;;  %s1102_s20 = sphi %s1145_s20, %s17_s20   ;;  %s1098_s19 = sphi %s1143_s19, %s1363_s19   ;;  %s1094_s18 = sphi %s1141_s18, %s1362_s18   ;;  %s1090_s17 = sphi %s1139_s17, %s1361_s17   ;;  %s1086_s16 = sphi %s1137_s16, %s1360_s16   ;;  %s1082_s15 = sphi %s1135_s15, %s1359_s15  }
   0x5   : > { %s36_s23 = sadd.s32 1, %s1098_s19  ;;  %s157_s24 = sadd.s32 1, %s1090_s17 }
   0x6   : > { %p38_p0 = scmp.ge.s32.totalorder %s36_s23, 2  ;;  %p167_p1 = scmp.ne.s32.totalorder %s1090_s17, %s1086_s16 }
   0x7   : > { %p168_p2 = scmp.eq.s32.totalorder %s761_s21, 1  ;;  %p173_p3 = scmp.ne.s32.totalorder %s1086_s16, %s1082_s15 }
   0x8   : > { %s1365_s23 = smov (%p38_p0, %s36_s23), 0  ;;  %p174_p5 = scmp.eq.s32.totalorder %s762_s22, 1 }
   0x9   : > { %p1175_p4 = por %p168_p2, %p167_p1  ;;  %s152_s26 = ssub.s32 %s1098_s19, %s1365_s23 }
   0xa   : > { %p765_p6 = scmp.ge.s32.totalorder %s1102_s20, 1  ;;  %p155_p7 = scmp.eq.s32.totalorder %s152_s26, 0 }
   0xb   : > { %p1182_p8 = por %p174_p5, %p173_p3  ;;  %p238_p9 = scmp.lt.s32.totalorder %s1102_s20, 3 }
   0xc   : > { %s1188_s28 = scalar_select %p155_p7, %s1090_s17, %s157_s24  }
   0xd   : > { %p239_p10 = pnand %p765_p6, %p238_p9 }
   0xe   : > { %p291_p11 = scmp.lt.s32.totalorder (!%p239_p10), %s1094_s18, 1  ;;  %vm332_vm0 = vcmask (!%p239_p10), 261120   ;;  %vm329_vm1 = vcmask (!%p239_p10), 7168   ;;  %v1104_v0 = vmov (!%p239_p10), 0.0|0.0   ;;  %v1105_v1 = vmov (!%p239_p10), 0.0   ;;  %s288_s26 = sand.u32 (!%p239_p10), 1, %s1086_s16  }
   0xf   : > { %242 = sbr.rel (%p239_p10) target bundleno = 908 (0x38c), region = 36  ;;  %900 = vmatprep.subr.bf16.mxu0 (!%p239_p10), %v1104_v0  ;;  %331 = vst.msk [vmem:[#allocation3] sm:$0xff] (!%p239_p10), %vm329_vm1, %v1105_v1  ;;  %932 = vmatprep.subr.bf16.mxu1 (!%p239_p10), %v1104_v0  ;;  %vm1106_vm2 = vmmov (!%p239_p10), 0   ;;  %v1107_v2 = vmov (!%p239_p10), 0   ;;  %vm1210_vm3 = vmpackc.low (!%p239_p10), %vm332_vm0, %vm332_vm0  ;;  %v1108_v30 = vmov (!%p239_p10), -inf   ;;  %v491_v31 = vlaneseq (!%p239_p10)  ;;  %s622_s10 = scalar_lea.sflag (!%p239_p10), [#allocation6], %s288_s26 }
  0x10   : > { %333 = vst.msk [vmem:[#allocation4] sm:$0xff] (!%p239_p10), %vm332_vm0, %v1105_v1  ;;  %862 = vmatprep.mubr.msk.f32.mxu0 (!%p239_p10), %vm1106_vm2, %v1105_v1  ;;  %1016 = vset.pattern.permute.xlu0 (!%p239_p10), %v1107_v2 }
  0x11   : > { %1017 = vset.pattern.permute.xlu1 (!%p239_p10), %v1107_v2  ;;  %897 = vmatprep.mubr.msk.f32.mxu1 (!%p239_p10), %vm1106_vm2, %v1105_v1  ;;  %330 = vst.msk [vmem:[#allocation2] sm:$0xff] (!%p239_p10), %vm329_vm1, %v1108_v30  ;;  %v492_v32 = vand.u32 (!%p239_p10), 127, %v491_v31 }
  0x13   : > { %vm501_vm5 = vcmp.lt.s32.totalorder (!%p239_p10), %v492_v32, 8 }
  0x16   : > { %s1196_s29 = scalar_select %p291_p11, %s1094_s18, 1 }
  0x18   : > { %s794_s30 = sshll.u32 %s1196_s29, 7  ;;  %s767_s8 = sshll.u32 %s1196_s29, 3  ;;  %v503_v51 = vld [vmem:[#allocation2] sm:$0xff] }
  0x19   : > { %s1204_s7 = scalar_lea.vmem %s1352_s2, %s794_s30  ;;  %s297_s11 = scalar_lea.vmem %s1350_s0, %s767_s8 }
  0x1a   : > { %v335_v3 = vld [vmem:[%s1204_s7] sm:$0xff]  ;;  %v336_v4 = vld [vmem:[%s1204_s7 + $0x8] sm:$0xff]  ;;  %v337_v7 = vld [vmem:[%s1204_s7 + $0x10] sm:$0xff]  ;;  %s304_s14 = scalar_lea.vmem %s1351_s1, %s767_s8  ;;  %s1269_s24 = scalar_lea.vmem %s1353_s3, %s794_s30 }
  0x1b   : > { %v901_v6 = vpack.c.bf16 %v336_v4, %v335_v3  ;;  %v338_v8 = vld [vmem:[%s1204_s7 + $0x18] sm:$0xff]  ;;  %v367_v9 = vld [vmem:[%s297_s11] sm:$0xff]  ;;  %v340_v12 = vld [vmem:[%s1204_s7 + $0x28] sm:$0xff]  ;;  %s766_s29 = sshll.u32 %s288_s26, 3  ;;  %s791_s30 = sshll.u32 %s1094_s18, 7 }
  0x1c   : > { %497 = vperm.xlu0 %1016, %v367_v9   ;;  %v905_v10 = vpack.c.bf16 %v338_v8, %v337_v7  ;;  %v339_v11 = vld [vmem:[%s1204_s7 + $0x20] sm:$0xff]  ;;  %v341_v14 = vld [vmem:[%s1204_s7 + $0x30] sm:$0xff]  ;;  %v342_v15 = vld [vmem:[%s1204_s7 + $0x38] sm:$0xff]  ;;  %s290_s5 = scalar_lea.vmem [#allocation5], %s766_s29  ;;  %s1302_s9 = scalar_lea.hbm %s1354_s4, %s791_s30 }
  0x1d   : > { %903 = vmatpush3.bf16.xpose.msk.msra.mxu0 %vm1210_vm3, %v901_v6  ;;  %v909_v13 = vpack.c.bf16 %v340_v12, %v339_v11  ;;  %v913_v16 = vpack.c.bf16 %v342_v15, %v341_v14  ;;  %v343_v17 = vld [vmem:[%s1204_s7 + $0x40] sm:$0xff]  ;;  %v344_v18 = vld [vmem:[%s1204_s7 + $0x48] sm:$0xff]  ;;  %v345_v20 = vld [vmem:[%s1204_s7 + $0x50] sm:$0xff]  ;;  %s636_s6 = sshll.u32 %s290_s5, 4  ;;  %s1109_s18 = smov [#allocation5]   ;;  %s1304_s6 = int_to_ptr.vmem [resolvable:$true] %s636_s6 }
  0x1e   : > { %904 = vmatprep.subr.bf16.mxu0 %v1104_v0  ;;  %v917_v19 = vpack.c.bf16 %v344_v18, %v343_v17  ;;  %v346_v21 = vld [vmem:[%s1204_s7 + $0x58] sm:$0xff]  ;;  %v347_v23 = vld [vmem:[%s1204_s7 + $0x60] sm:$0xff]  ;;  %v348_v24 = vld [vmem:[%s1204_s7 + $0x68] sm:$0xff]  ;;  %s1024_s11 = scalar_lea.vmem %s1304_s6, 128  ;;  %s1028_s12 = sshll.u32 %s1109_s18, 4  ;;  %s1029_s12 = int_to_ptr.vmem [resolvable:$false] %s1028_s12 }
  0x1f   : > { %v921_v22 = vpack.c.bf16 %v346_v21, %v345_v20  ;;  %v925_v25 = vpack.c.bf16 %v348_v24, %v347_v23  ;;  %v349_v26 = vld [vmem:[%s1204_s7 + $0x70] sm:$0xff]  ;;  %v350_v27 = vld [vmem:[%s1204_s7 + $0x78] sm:$0xff]  ;;  %v334_v29 = vld [vmem:[%s304_s14] sm:$0xff]  ;;  %p1025_p12 = scmp.ne.s32.totalorder %s1304_s6, %s1024_s11  ;;  %s1030_s13 = scalar_lea.vmem %s1029_s12, 256 }
  0x20   : > { %v929_v28 = vpack.c.bf16 %v350_v27, %v349_v26  ;;  %v351_v39 = vld [vmem:[%s1269_s24] sm:$0xff]  ;;  %v352_v40 = vld [vmem:[%s1269_s24 + $0x8] sm:$0xff]  ;;  %v353_v41 = vld [vmem:[%s1269_s24 + $0x10] sm:$0xff]  ;;  %p1031_p1 = scmp.lt.s32.totalorder %s1304_s6, %s1029_s12  ;;  %p1032_p2 = scmp.lt.s32.totalorder %s1030_s13, %s1024_s11 }
  0x21   : > { %v933_v42 = vpack.c.bf16 %v352_v40, %v351_v39  ;;  %v354_v43 = vld [vmem:[%s1269_s24 + $0x18] sm:$0xff]  ;;  %v355_v45 = vld [vmem:[%s1269_s24 + $0x20] sm:$0xff]  ;;  %v356_v46 = vld [vmem:[%s1269_s24 + $0x28] sm:$0xff]  ;;  %p1026_p13 = pnand %p1025_p12, %p1175_p4 }
  0x22   : > { %v936_v44 = vpack.c.bf16 %v354_v43, %v353_v41  ;;  %v939_v47 = vpack.c.bf16 %v356_v46, %v355_v45  ;;  %v357_v48 = vld [vmem:[%s1269_s24 + $0x30] sm:$0xff]  ;;  %v358_v49 = vld [vmem:[%s1269_s24 + $0x38] sm:$0xff]  ;;  %v359_v53 = vld [vmem:[%s1269_s24 + $0x40] sm:$0xff]  ;;  %p1033_p3 = por %p1032_p2, %p1031_p1 }
  0x23   : > { %934 = vmatpush3.bf16.msra.mxu1 %v933_v42  ;;  %v942_v50 = vpack.c.bf16 %v358_v49, %v357_v48  ;;  %v360_v54 = vld [vmem:[%s1269_s24 + $0x48] sm:$0xff]  ;;  %v361_v58 = vld [vmem:[%s1269_s24 + $0x50] sm:$0xff]  ;;  %v362_v59 = vld [vmem:[%s1269_s24 + $0x58] sm:$0xff]  ;;  %p1027_p0 = pneg %p1026_p13 }
  0x24   : > { %935 = vmatprep.subr.bf16.mxu1 %v1104_v0  ;;  %v945_v56 = vpack.c.bf16 %v360_v54, %v359_v53  ;;  %v948_v61 = vpack.c.bf16 %v362_v59, %v361_v58  ;;  %v363_v62 = vld [vmem:[%s1269_s24 + $0x60] sm:$0xff]  ;;  %v364_v63 = vld [vmem:[%s1269_s24 + $0x68] sm:$0xff]  ;;  %v365_v2 = vld [vmem:[%s1269_s24 + $0x70] sm:$0xff] }
  0x25   : > { %907 = vmatpush3.bf16.xpose.msk.msra.mxu0 %vm1210_vm3, %v905_v10  ;;  %v951_v1 = vpack.c.bf16 %v364_v63, %v363_v62  ;;  %v366_v3 = vld [vmem:[%s1269_s24 + $0x78] sm:$0xff]  ;;  %v518_v10 = vld [vmem:[#allocation3] sm:$0xff]  ;;  %v525_v18 = vld [vmem:[#allocation4] sm:$0xff]  ;;  %p1034_p5 = pnand %p1033_p3, %p1027_p0 }
  0x26   : > { %908 = vmatprep.subr.bf16.mxu0 %v1104_v0  ;;  %v954_v4 = vpack.c.bf16 %v366_v3, %v365_v2 }
  0x27   : > { %937 = vmatpush3.bf16.msra.mxu1 %v936_v44 }
  0x28   : > { %938 = vmatprep.subr.bf16.mxu1 %v1104_v0 }
  0x2b   : > { %940 = vmatpush3.bf16.msra.mxu1 %v939_v47 }
  0x2c   : > { %941 = vmatprep.subr.bf16.mxu1 %v1104_v0 }
  0x2d   : > { %911 = vmatpush3.bf16.xpose.msk.msra.mxu0 %vm1210_vm3, %v909_v13 }
  0x2e   : > { %912 = vmatprep.subr.bf16.mxu0 %v1104_v0 }
  0x2f   : > { %943 = vmatpush3.bf16.msra.mxu1 %v942_v50 }
  0x30   : > { %944 = vmatprep.subr.bf16.mxu1 %v1104_v0 }
  0x33   : > { %946 = vmatpush3.bf16.msra.mxu1 %v945_v56 }
  0x34   : > { %947 = vmatprep.subr.bf16.mxu1 %v1104_v0 }
  0x35   : > { %915 = vmatpush3.bf16.xpose.msk.msra.mxu0 %vm1210_vm3, %v913_v16 }
  0x36   : > { %916 = vmatprep.subr.bf16.mxu0 %v1104_v0 }
  0x37   : > { %949 = vmatpush3.bf16.msra.mxu1 %v948_v61 }
  0x38   : > { %950 = vmatprep.subr.bf16.mxu1 %v1104_v0 }
  0x3b   : > { %952 = vmatpush3.bf16.msra.mxu1 %v951_v1 }
  0x3c   : > { %953 = vmatprep.subr.bf16.mxu1 %v1104_v0 }
  0x3d   : > { %919 = vmatpush3.bf16.xpose.msk.msra.mxu0 %vm1210_vm3, %v917_v19 }
  0x3e   : > { %920 = vmatprep.subr.bf16.mxu0 %v1104_v0 }
  0x3f   : > { %955 = vmatpush3.bf16.msra.mxu1 %v954_v4 }
  0x45   : > { %923 = vmatpush3.bf16.xpose.msk.msra.mxu0 %vm1210_vm3, %v921_v22 }
  0x46   : > { %924 = vmatprep.subr.bf16.mxu0 %v1104_v0 }
  0x4d   : > { %927 = vmatpush3.bf16.xpose.msk.msra.mxu0 %vm1210_vm3, %v925_v25 }
  0x4e   : > { %928 = vmatprep.subr.bf16.mxu0 %v1104_v0 }
  0x55   : > { %931 = vmatpush3.bf16.xpose.msk.msra.mxu0 %vm1210_vm3, %v929_v28 }
  0x5c   : > { %863 = vmatmul.mubr.msk.f32.vlgmr.msra.gmra.mrb[0].mxu0 %vm332_vm0, %v334_v29 }
  0x9b   : > { %v498_v33 = vpop.permute.xlu0 %497 }
  0x9c   : > { %vm499_vm4 = vcmp.lt.s32.totalorder %v492_v32, %v498_v33 }
 0x12f   : > { %v486_v34 = vpop.f32.mrb[0].mxu0 }
 0x130   : > { %v490_v35 = vmul.f32 0.17677669, %v486_v34  ;;  %v864_v36 = vpop.f32.mrb[1].mxu0 }
 0x132   : > { %v500_v37 = vsel %vm499_vm4, %v490_v35, -1000000.0 }
 0x133   : > { %v502_v38 = vsel %vm501_vm5, %v500_v37, -1e+30 }
 0x134   : > { %504 = vmax.xlane.f32.xlu0 %v502_v38 }
 0x1c1   : > { %v505_v52 = vpop.xlane.xlu0 %504 }
 0x1c2   : > { %v506_v55 = vmax.f32 %v503_v51, %v505_v52 }
 0x1c4   : > { %v507_v57 = vsub.f32 %v503_v51, %v506_v55  ;;  %604 = vst.msk [vmem:[#allocation2] sm:$0xff] %vm329_vm1, %v506_v55  ;;  %512 = vperm.xlu1 %1017, %v506_v55  }
 0x1c6   : > { %v508_v60 = vmul.f32 1.442695, %v507_v57 }
 0x1c8   : > { %1018 = vpow2.f32 %v508_v60 }
 0x1d2   : > { %v1019_v5 = vpop.eup %1018 }
 0x1d3   : > { %528 = vperm.xlu0 %1016, %v1019_v5   ;;  %v519_v11 = vmul.f32 %v1019_v5, %v518_v10 }
 0x243   : > { %v513_v6 = vpop.permute.xlu1 %512 }
 0x244   : > { %v515_v7 = vsub.f32 %v502_v38, %v513_v6 }
 0x246   : > { %v516_v8 = vmul.f32 1.442695, %v515_v7 }
 0x248   : > { %1020 = vpow2.f32 %v516_v8 }
 0x252   : > { %v1021_v9 = vpop.eup %1020  ;;  %v529_v19 = vpop.permute.xlu0 %528 }
 0x253   : > { %520 = vadd.xlane.f32.xlu1 %v1021_v9  ;;  %898 = vmatmul.mubr.f32.vlgmr.msra.gmra.mrb[0].mxu1 %v1021_v9  ;;  %v531_v20 = vmul.f32 %v529_v19, %v525_v18 }
 0x2e0   : > { %v521_v12 = vpop.xlane.xlu1 %520 }
 0x2e1   : > { %v522_v13 = vadd.f32 %v521_v12, %v519_v11 }
 0x2e3   : > { %524 = vst.msk [vmem:[#allocation3] sm:$0xff] %vm329_vm1, %v522_v13 }
 0x2ea   : > { %v608_v14 = vld [vmem:[#allocation3] sm:$0xff] }
 0x2eb   : > { %1022 = vrcp.f32 %v608_v14 }
 0x2f5   : > { %v1023_v0 = vpop.eup %1022 }
 0x2f6   : > { %v610_v15 = vmul.f32 %v1023_v0, %v608_v14 }
 0x2f8   : > { %v611_v16 = vsub.f32 2.0, %v610_v15 }
 0x2fa   : > { %v612_v17 = vmul.f32 %v1023_v0, %v611_v16 }
 0x2fc   : > { %616 = vperm.xlu1 %1017, %v612_v17  }
 0x326   : > { %v598_v21 = vpop.f32.mrb[0].mxu1 }
 0x327   : > { %v602_v22 = vadd.f32 %v598_v21, %v531_v20  ;;  %v899_v23 = vpop.f32.mrb[1].mxu1 }
 0x329   : > { %603 = vst.msk [vmem:[#allocation4] sm:$0xff] %vm332_vm0, %v602_v22 }
 0x330   : > { %v613_v24 = vld [vmem:[#allocation4] sm:$0xff] }
 0x37b   : > { %v617_v25 = vpop.permute.xlu1 %616 }
 0x37c   : > { %v619_v26 = vmul.f32 %v617_v25, %v613_v24 }
 0x37e   : > { %620 = vst.msk [vmem:[%s290_s5] sm:$0xff] %vm332_vm0, %v619_v26 }
 0x37f   : > { %1037 = shalt.err (!%p1034_p5)
}
 0x380   : > { %s1038_s14 = scalar_lea.hbm %s1302_s9, 128  ;;  %s1042_s24 = scalar_lea.hbm %s1354_s4, 256 }
 0x381   : > { %p1039_p6 = scmp.ne.s32.totalorder %s1302_s9, %s1038_s14  ;;  %p1043_p10 = scmp.lt.u32.totalorder %s1302_s9, %s1354_s4 }
 0x382   : > { %p1044_p11 = scmp.lt.u32.totalorder %s1042_s24, %s1038_s14  ;;  %p1046_p13 = scmp.lt.u32.totalorder %s1038_s14, %s1302_s9 }
 0x383   : > { %p1040_p7 = pnand %p1039_p6, %p1175_p4 }
 0x384   : > { %p1045_p12 = por %p1044_p11, %p1043_p10 }
 0x385   : > { %p1041_p9 = pneg %p1040_p7 }
 0x386   : > { %p1047_p0 = por %p1046_p13, %p1045_p12 }
 0x388   : > { %p1048_p1 = pnand %p1047_p0, %p1041_p9 }
 0x38a   : > { %1051 = shalt.err (!%p1048_p1)
}
 0x38b   : > { %956 = dma.vmem_to_hbm [thread:$0]  (%p1175_p4), %s1304_s6, 128, %s1302_s9, %s622_s10  }
 0x38c PF: > { %p962_p2 = scmp.ge.s32.totalorder %s1102_s20, 2  ;;  %s648_s30 = sand.u32 1, %s1082_s15  }
 0x38d   : > { %s649_s5 = scalar_lea.sflag [#allocation6], %s648_s30 }
 0x38e   : > { %p959_p3 = pnand %p962_p2, %p1182_p8 }
 0x390   : > { %1077 = dma.done.wait (!%p959_p3), %s649_s5, 128  }
 0x391   : > { %1079 = vsyncadd (!%p959_p3), %s649_s5, 4294967168  ;;  %s17_s20 = sadd.s32 1, %s1102_s20   ;;  %s1359_s15 = smov %s1086_s16 }
 0x392   : > { %p14_p5 = scmp.ge.s32.totalorder %s17_s20, 4   ;;  %s1360_s16 = smov %s1090_s17 }
 0x393   : > { %s1361_s17 = smov %s1188_s28  ;;  %s1362_s18 = smov %s1098_s19 }
 0x394   : > { %s1363_s19 = smov %s1365_s23  ;;  %16 = sbr.rel (!%p14_p5) target bundleno = 4 (0x4), region = 88 }
 0x39b   :  { %654 = vsyncpa [#allocation6], 1 }
 0x39c   :  { %656 = vsyncpa [#allocation6 + $0x1], 1 }

</bundles_post_ra>
